<compile_context>
chip_gen: v6e
topology: v6e:2x2x1
jax: 0.10.0
libtpu: 0.0.40
codegen_flags: <defaults>
</compile_context>

<pallas_src>
import jax
import jax.numpy as jnp
from jax import lax
from jax.experimental import pallas as pl
from jax.experimental.pallas import tpu as pltpu

_LANES = 128
_EPS = 1e-6

# Largest row count handled as a single full-array block (grid=(1,)):
# 2048 rows * 128 lanes * 4 B = 1 MiB per input -> fits comfortably in the
# scoped-VMEM default on all generations (including v7x's 64 MiB physical).
_MAX_SINGLE_BLOCK_ROWS = 2048
# Row tile for larger inputs: 512*128*4 B = 256 KiB per input block;
# 2 inputs x 2 pipeline buffers + accumulator ~ 1.25 MiB of VMEM.
_TILE_ROWS = 512


def _make_bce_kernel(n_elems, tile_rows, needs_mask):
    """Builds the BCE-sum kernel with static tail-mask parameters closed over."""

    def kernel(x_ref, y_ref, out_ref, acc_ref):
        i = pl.program_id(0)

        @pl.when(i == 0)
        def _():
            acc_ref[...] = jnp.zeros_like(acc_ref)

        x = x_ref[...]
        y = y_ref[...]
        loss = -y * jnp.log(x + _EPS) - (1.0 - y) * jnp.log(1.0 - x + _EPS)

        if needs_mask:
            # Zero the padded tail via a select on the flat element index
            # (static n_elems baked in; nan/inf in padded lanes cannot leak
            # through a select).
            row = lax.broadcasted_iota(jnp.int32, loss.shape, 0)
            lane = lax.broadcasted_iota(jnp.int32, loss.shape, 1)
            flat = (i * tile_rows + row) * _LANES + lane
            loss = jnp.where(flat < n_elems, loss, 0.0)

        # Pure VALU accumulation; no per-step cross-lane reduce, no per-step
        # SMEM scalar read-modify-write.
        acc_ref[...] += loss

        @pl.when(i == pl.num_programs(0) - 1)
        def _():
            out_ref[0, 0] = jnp.sum(acc_ref[...])

    return kernel


def loss_model_global(x, y):
    """JAX/Pallas equivalent of the PyTorch loss_model_global.forward."""
    assert x.shape == y.shape, "x and y must have the same shape"
    n_elems = int(x.size)

    x_flat = jnp.ravel(x).astype(jnp.float32)
    y_flat = jnp.ravel(y).astype(jnp.float32)

    rows_needed = -(-n_elems // _LANES)
    if rows_needed <= _MAX_SINGLE_BLOCK_ROWS:
        # Single full-array block; (8,128) divisibility is waived because the
        # block equals the full array dims.
        tile_rows = rows_needed
        grid_rows = rows_needed
    else:
        tile_rows = _TILE_ROWS
        grid_rows = -(-rows_needed // tile_rows) * tile_rows

    total_padded = grid_rows * _LANES
    needs_mask = total_padded != n_elems
    if needs_mask:
        pad = total_padded - n_elems
        # Pad x with 0.5 (keeps both logs finite); padded positions are
        # zeroed in-kernel via the iota mask.
        x_flat = jnp.pad(x_flat, (0, pad), constant_values=0.5)
        y_flat = jnp.pad(y_flat, (0, pad), constant_values=0.0)

    x2d = x_flat.reshape(grid_rows, _LANES)
    y2d = y_flat.reshape(grid_rows, _LANES)

    grid = (grid_rows // tile_rows,)
    row_spec = pl.BlockSpec((tile_rows, _LANES), lambda i: (i, 0))
    kernel = _make_bce_kernel(n_elems, tile_rows, needs_mask)

    total_sum = pl.pallas_call(
        kernel,
        out_shape=jax.ShapeDtypeStruct((1, 1), jnp.float32),
        grid_spec=pltpu.PrefetchScalarGridSpec(
            num_scalar_prefetch=0,
            grid=grid,
            in_specs=[row_spec, row_spec],
            out_specs=pl.BlockSpec(
                (1, 1), lambda i: (0, 0), memory_space=pltpu.SMEM),
            scratch_shapes=[pltpu.VMEM((tile_rows, _LANES), jnp.float32)],
        ),
        compiler_params=pltpu.CompilerParams(
            dimension_semantics=("arbitrary",)),
    )(x2d, y2d)

    return total_sum[0, 0] / jnp.float32(n_elems)


if __name__ == "__main__":
    key = jax.random.PRNGKey(0)
    kx, ky = jax.random.split(key)

    # x plays the role of predicted probabilities (in (0,1)), y the labels.
    shape = (2, 4, 16, 16)
    x = jax.random.uniform(kx, shape, dtype=jnp.float32,
                           minval=0.01, maxval=0.99)
    y = (jax.random.uniform(ky, shape, dtype=jnp.float32) > 0.5).astype(
        jnp.float32)

    out = loss_model_global(x, y)
    out = jax.block_until_ready(out)

    # Sanity check against plain-JAX reference of the PyTorch formula.
    ref = jnp.mean(-y * jnp.log(x + _EPS) - (1.0 - y) * jnp.log(1.0 - x + _EPS))
    assert jnp.allclose(out, ref, rtol=1e-5, atol=1e-6), (out, ref)

    print("KERNEL_OK")
</pallas_src>

<mosaic_0001>
module attributes {stable_mosaic.version = 11 : i64} {
  func.func @kernel(%arg0: i32, %arg1: memref<16x128xf32, #tpu.memory_space<vmem>>, %arg2: memref<16x128xf32, #tpu.memory_space<vmem>>, %arg3: memref<1x1xf32, #tpu.memory_space<smem>>, %arg4: memref<16x128xf32, #tpu.memory_space<vmem>>) attributes {dimension_semantics = [#tpu.dimension_semantics<arbitrary>], iteration_bounds = array<i64: 1>, scalar_prefetch = 0 : i64, scratch_operands = 1 : i64, tpu.core_type = #tpu.core_type<tc>, window_params = [{transform_indices = @transform_0, window_bounds = array<i64: 16, 128>}, {transform_indices = @transform_1, window_bounds = array<i64: 16, 128>}, {transform_indices = @transform_2, window_bounds = array<i64: 1, 1>}]} {
    %c0_i32 = arith.constant 0 : i32
    %0 = arith.cmpi eq, %arg0, %c0_i32 : i32
    %1 = arith.extui %0 : i1 to i32
    %c0_i32_0 = arith.constant 0 : i32
    %2 = arith.cmpi ne, %1, %c0_i32_0 : i32
    scf.if %2 {
      %cst_14 = arith.constant 0.000000e+00 : f32
      %26 = vector.broadcast %cst_14 : f32 to vector<16x128xf32>
      %c0_15 = arith.constant 0 : index
      %c0_16 = arith.constant 0 : index
      %27 = vector.load %arg4[%c0_15, %c0_16] : memref<16x128xf32, #tpu.memory_space<vmem>>, vector<16x128xf32>
      tpu.vector_store %arg4[%c0_15, %c0_16], %26 {strides = array<i32>} : memref<16x128xf32, #tpu.memory_space<vmem>>, vector<16x128xf32>,
    } else {
    }
    %c0 = arith.constant 0 : index
    %c0_1 = arith.constant 0 : index
    %3 = vector.load %arg1[%c0, %c0_1] : memref<16x128xf32, #tpu.memory_space<vmem>>, vector<16x128xf32>
    %c0_2 = arith.constant 0 : index
    %c0_3 = arith.constant 0 : index
    %4 = vector.load %arg2[%c0_2, %c0_3] : memref<16x128xf32, #tpu.memory_space<vmem>>, vector<16x128xf32>
    %cst = arith.constant 0.000000e+00 : f32
    %5 = vector.broadcast %cst : f32 to vector<16x128xf32>
    %6 = arith.subf %5, %4 : vector<16x128xf32>
    %cst_4 = arith.constant 9.99999997E-7 : f32
    %7 = vector.broadcast %cst_4 : f32 to vector<16x128xf32>
    %8 = arith.addf %3, %7 : vector<16x128xf32>
    %9 = math.log %8 : vector<16x128xf32>
    %10 = arith.mulf %6, %9 : vector<16x128xf32>
    %cst_5 = arith.constant 1.000000e+00 : f32
    %11 = vector.broadcast %cst_5 : f32 to vector<16x128xf32>
    %12 = arith.subf %11, %4 : vector<16x128xf32>
    %cst_6 = arith.constant 1.000000e+00 : f32
    %13 = vector.broadcast %cst_6 : f32 to vector<16x128xf32>
    %14 = arith.subf %13, %3 : vector<16x128xf32>
    %cst_7 = arith.constant 9.99999997E-7 : f32
    %15 = vector.broadcast %cst_7 : f32 to vector<16x128xf32>
    %16 = arith.addf %14, %15 : vector<16x128xf32>
    %17 = math.log %16 : vector<16x128xf32>
    %18 = arith.mulf %12, %17 : vector<16x128xf32>
    %19 = arith.subf %10, %18 : vector<16x128xf32>
    %c0_8 = arith.constant 0 : index
    %c0_9 = arith.constant 0 : index
    %20 = vector.load %arg4[%c0_8, %c0_9] : memref<16x128xf32, #tpu.memory_space<vmem>>, vector<16x128xf32>
    %21 = arith.addf %20, %19 : vector<16x128xf32>
    %c0_10 = arith.constant 0 : index
    %c0_11 = arith.constant 0 : index
    %22 = vector.load %arg4[%c0_10, %c0_11] : memref<16x128xf32, #tpu.memory_space<vmem>>, vector<16x128xf32>
    tpu.vector_store %arg4[%c0_10, %c0_11], %21 {strides = array<i32>} : memref<16x128xf32, #tpu.memory_space<vmem>>, vector<16x128xf32>,
    %c0_i32_12 = arith.constant 0 : i32
    %23 = arith.cmpi eq, %arg0, %c0_i32_12 : i32
    %24 = arith.extui %23 : i1 to i32
    %c0_i32_13 = arith.constant 0 : i32
    %25 = arith.cmpi ne, %24, %c0_i32_13 : i32
    scf.if %25 {
      %c0_14 = arith.constant 0 : index
      %c0_15 = arith.constant 0 : index
      %26 = vector.load %arg4[%c0_14, %c0_15] : memref<16x128xf32, #tpu.memory_space<vmem>>, vector<16x128xf32>
      %27 = vector.shape_cast %26 : vector<16x128xf32> to vector<1x16x128xf32>
      %cst_16 = arith.constant dense<0.000000e+00> : vector<1xf32>
      %28 = vector.multi_reduction <add>, %27, %cst_16 [1, 2] : vector<1x16x128xf32> to vector<1xf32>
      %29 = vector.shape_cast %28 : vector<1xf32> to vector<1x1x1xf32>
      %30 = vector.extract %29[0, 0, 0] : f32 from vector<1x1x1xf32>
      %c0_17 = arith.constant 0 : index
      %c0_18 = arith.constant 0 : index
      %31 = memref.load %arg3[%c0_17, %c0_18] : memref<1x1xf32, #tpu.memory_space<smem>>
      memref.store %30, %arg3[%c0_17, %c0_18] : memref<1x1xf32, #tpu.memory_space<smem>>
    } else {
    }
    return
  }
  func.func @transform_0(%arg0: i32) -> (i32, i32) {
    %c0_i32 = arith.constant 0 : i32
    %c0_i32_0 = arith.constant 0 : i32
    return %arg0, %c0_i32 : i32, i32
  }
  func.func @transform_1(%arg0: i32) -> (i32, i32) {
    %c0_i32 = arith.constant 0 : i32
    %c0_i32_0 = arith.constant 0 : i32
    return %arg0, %c0_i32 : i32, i32
  }
  func.func @transform_2(%arg0: i32) -> (i32, i32) {
    %c0_i32 = arith.constant 0 : i32
    %c0_i32_0 = arith.constant 0 : i32
    %c0_i32_1 = arith.constant 0 : i32
    return %c0_i32, %c0_i32_0 : i32, i32
  }
}

</mosaic_0001>

<bundles_post_ra>
// kernel: tpu_custom_call.1
= control target key start
LH: loop header
LB: loop body
LE: loop exit
PB: predicated region body
PF: predicated region fallthrough
CT: control target
= control target key end

     0   :  { %7 = vsyncpa [#allocation4], 0  ;;  %s210_s0 = inlined_call_operand.hbm [shape: f32[16,128], index: 0, kind: input, shape index: {}]   ;;  %s211_s1 = inlined_call_operand.hbm [shape: f32[16,128], index: 1, kind: input, shape index: {}]   ;;  %s212_s2 = inlined_call_operand.hbm [shape: f32[1,1], index: 2, kind: output, shape index: {}]  }
   0x1   :  { %8 = vsyncpa [#allocation7], 0 }
   0x2   :  { %9 = vsyncpa [#allocation5], 0  ;;  %s181_s9 = smov [#allocation3]  }
   0x3   :  { %s15_s10 = sshll.u32 %s181_s9, 4  ;;  %s16_s10 = int_to_ptr.vmem [resolvable:$true] %s15_s10 }
   0x4   :  { %s135_s11 = scalar_lea.vmem %s16_s10, 256  ;;  %p140_p1 = scmp.lt.s32.totalorder %s16_s10, %s16_s10 }
   0x5   :  { %p136_p0 = scmp.ne.s32.totalorder %s16_s10, %s135_s11  ;;  %p141_p2 = scmp.lt.s32.totalorder %s135_s11, %s135_s11 }
   0x7   :  { %p142_p3 = por %p141_p2, %p140_p1 }
   0x9   :  { %p143_p4 = pnand %p142_p3, %p136_p0 }
   0xb   :  { %146 = shalt.err (!%p143_p4)
}
   0xc   :  { %s182_s12 = smov 128   ;;  %s183_s13 = smov 8  }
   0xd   :  { %21 = dma.hbm_to_vmem [thread:$0]  %s210_s0, 256, %s16_s10, [#allocation4], %s182_s12, %s182_s12, %s183_s13  }
   0xe   :  { %s184_s16 = smov [#allocation6]  }
   0xf   :  { %s27_s17 = sshll.u32 %s184_s16, 4  ;;  %s28_s17 = int_to_ptr.vmem [resolvable:$true] %s27_s17 }
  0x10   :  { %s155_s18 = scalar_lea.vmem %s28_s17, 256  ;;  %p160_p6 = scmp.lt.s32.totalorder %s28_s17, %s28_s17 }
  0x11   :  { %p156_p5 = scmp.ne.s32.totalorder %s28_s17, %s155_s18  ;;  %p161_p7 = scmp.lt.s32.totalorder %s155_s18, %s155_s18 }
  0x13   :  { %p162_p8 = por %p161_p7, %p160_p6 }
  0x15   :  { %p163_p9 = pnand %p162_p8, %p156_p5 }
  0x17   :  { %166 = shalt.err (!%p163_p9)
}
  0x18   :  { %33 = dma.hbm_to_vmem [thread:$0]  %s211_s1, 256, %s28_s17, [#allocation7], %s182_s12, %s182_s12, %s183_s13  }
  0x19   :  { %175 = dma.done.wait [#allocation4], 256  }
  0x1a   :  { %176 = vsyncadd [#allocation4], 4294967040 }
  0x1b   :  { %177 = dma.done.wait [#allocation7], 256  }
  0x1c   :  { %178 = vsyncadd [#allocation7], 4294967040  ;;  %v46_v0 = vld [vmem:[#allocation3] sm:$0xff]  ;;  %v47_v1 = vld [vmem:[#allocation3 + $0x8] sm:$0xff]  ;;  %s185_s1 = smov [#allocation8]  }
  0x1d   :  { %v52_v2 = vadd.f32 1e-06, %v46_v0  ;;  %v53_v3 = vadd.f32 1e-06, %v47_v1  ;;  %v62_v4 = vsub.f32 1.0, %v46_v0  ;;  %v63_v5 = vsub.f32 1.0, %v47_v1 }
  0x1e   :  { %v48_v8 = vld [vmem:[#allocation6] sm:$0xff]  ;;  %v49_v9 = vld [vmem:[#allocation6 + $0x8] sm:$0xff] }
  0x1f   :  { %119 = vlog2.f32 %v52_v2  ;;  %v64_v6 = vadd.f32 1e-06, %v62_v4  ;;  %v65_v7 = vadd.f32 1e-06, %v63_v5  ;;  %v50_v11 = vsub.f32 0.0, %v48_v8 }
  0x20   :  { %121 = vlog2.f32 %v53_v3  ;;  %v51_v13 = vsub.f32 0.0, %v49_v9  ;;  %v60_v16 = vsub.f32 1.0, %v48_v8  ;;  %v61_v18 = vsub.f32 1.0, %v49_v9 }
  0x21   :  { %123 = vlog2.f32 %v64_v6 }
  0x22   :  { %125 = vlog2.f32 %v65_v7 }
  0x2c   :  { %v120_v10 = vpop.eup %119 }
  0x2d   :  { %v122_v12 = vpop.eup %121  ;;  %v55_v14 = vmul.f32 0.6931472, %v120_v10 }
  0x2e   :  { %v57_v15 = vmul.f32 0.6931472, %v122_v12  ;;  %v124_v17 = vpop.eup %123 }
  0x2f   :  { %v126_v19 = vpop.eup %125  ;;  %v58_v20 = vmul.f32 %v55_v14, %v50_v11  ;;  %v67_v21 = vmul.f32 0.6931472, %v124_v17 }
  0x30   :  { %v59_v22 = vmul.f32 %v57_v15, %v51_v13  ;;  %v69_v23 = vmul.f32 0.6931472, %v126_v19 }
  0x31   :  { %v70_v24 = vmul.f32 %v67_v21, %v60_v16 }
  0x32   :  { %v71_v25 = vmul.f32 %v69_v23, %v61_v18 }
  0x33   :  { %v72_v26 = vsub.f32 %v58_v20, %v70_v24 }
  0x34   :  { %v73_v27 = vsub.f32 %v59_v22, %v71_v25 }
  0x36   :  { %v85_v28 = vadd.f32 %v73_v27, %v72_v26 }
  0x38   :  { %86 = vadd.xlane.f32.xlu0 %v85_v28 }
  0xc1   :  { %v87_v29 = vpop.xlane.xlu0 %86 }
  0xc2   :  { %v88_v30 = vrot.slane %v87_v29, 4 }
  0xc4   :  { %v89_v31 = vadd.f32 %v88_v30, %v87_v29 }
  0xc6   :  { %v90_v32 = vrot.slane %v89_v31, 2 }
  0xc8   :  { %v91_v33 = vadd.f32 %v90_v32, %v89_v31 }
  0xca   :  { %v92_v34 = vrot.slane %v91_v33, 1 }
  0xcc   :  { %v93_v35 = vadd.f32 %v92_v34, %v91_v33 }
  0xce   :  { %112 = vpush %v93_v35 }
  0xff   :  { %s113_s0 = spop %112 }
 0x100   :  { %96 = sst [smem:[#allocation8]] %s113_s0 }
 0x101   :  { %104 = dma.smem_to_hbm %s185_s1, 16, %s212_s2, [#allocation5]  }
 0x102   :  { %179 = dma.done.wait [#allocation5], 16  }
 0x103   :  { %180 = vsyncadd [#allocation5], 4294967280 }
 0x104   :  { %108 = sfence }
 0x105   :  { %109 = vsyncpa [#allocation4], 1 }
 0x106   :  { %110 = vsyncpa [#allocation7], 1 }
 0x107   :  { %111 = vsyncpa [#allocation5], 1 }

</bundles_post_ra>
